<compile_context>
chip_gen: v7x
topology: tpu7x:2x2x1
jax: 0.10.0
libtpu: 0.0.40
codegen_flags: <defaults>
</compile_context>

<pallas_src>
import functools

import jax
import jax.numpy as jnp
from jax.experimental import pallas as pl
from jax.experimental.pallas import tpu as pltpu


STEP_SIZE = 0.9  # deterministic "parameter" of Gap(denoiser, step_size)


def _gap_kernel(x_ref, phi_ref, dy_ref, inv_ref, o_ref, *, two_step):
    # x_ref:   (1, F, T)  current estimate tile for this (batch, hw-tile)
    # phi_ref: (F, T)     sensing-mask tile (shared across batch)
    # dy_ref:  (1, T)     delta_y tile (shared across batch)
    # inv_ref: (1, T)     precomputed 1 / (phi.sum(0) + 1e-4) tile
    # o_ref:   (1, F, T)  updated x tile
    x = x_ref[0]                                      # (F, T)
    phi = phi_ref[...]                                # (F, T)

    # y_t = (x * phi).sum(frame)  -> (1, T)   (only reduction: over F)
    y_t = jnp.sum(x * phi, axis=0, keepdims=True)

    # residual = (delta_y + (delta_y - y_t)) - y_t = 2 * (delta_y - y_t)
    # delta_x  = step * residual * phi / (phi_sum + 1e-4) = scale * phi
    scale = (two_step * (dy_ref[...] - y_t)) * inv_ref[...]   # (1, T)

    o_ref[0] = x + scale * phi


def _pick_lane_tile(F, HW, itemsize, target_bytes=2 << 20):
    """Lane tile T: multiple of 128, ~target_bytes for one (F, T) x block."""
    t = (target_bytes // (itemsize * F)) // 128 * 128
    t = max(128, t)
    hw_pad128 = ((HW + 127) // 128) * 128
    return min(t, hw_pad128)


def gap_update(x, phi, delta_y, step_size=STEP_SIZE):
    """GAP update: returns updated x.

    x:       (B, F, H, W) float32
    phi:     (F, H, W)    float32
    delta_y: (H, W)       float32
    """
    B, F, H, W = x.shape
    HW = H * W
    itemsize = jnp.dtype(x.dtype).itemsize

    T = _pick_lane_tile(F, HW, itemsize)
    hw_pad = ((HW + T - 1) // T) * T          # pad so every tile is full / lane-dense
    num_tiles = hw_pad // T

    x_flat = x.reshape(B, F, HW)
    phi_flat = phi.reshape(F, HW)
    dy_flat = delta_y.reshape(1, HW)
    if hw_pad != HW:
        pad = hw_pad - HW
        x_flat = jnp.pad(x_flat, ((0, 0), (0, 0), (0, pad)))
        phi_flat = jnp.pad(phi_flat, ((0, 0), (0, pad)))      # phi=0 -> delta_x=0 in pad
        dy_flat = jnp.pad(dy_flat, ((0, 0), (0, pad)))

    # Batch-invariant: exact reciprocal computed ONCE in the wrapper (reused B times).
    inv_flat = 1.0 / (jnp.sum(phi_flat, axis=0, keepdims=True) + 0.0001)
    inv_flat = inv_flat.astype(x.dtype)

    kernel = functools.partial(_gap_kernel, two_step=2.0 * float(step_size))

    out = pl.pallas_call(
        kernel,
        out_shape=jax.ShapeDtypeStruct((B, F, hw_pad), x.dtype),
        grid_spec=pltpu.PrefetchScalarGridSpec(
            num_scalar_prefetch=0,
            grid=(B, num_tiles),
            in_specs=[
                pl.BlockSpec((1, F, T), lambda b, t: (b, 0, t)),
                pl.BlockSpec((F, T), lambda b, t: (0, t)),
                pl.BlockSpec((1, T), lambda b, t: (0, t)),
                pl.BlockSpec((1, T), lambda b, t: (0, t)),
            ],
            out_specs=pl.BlockSpec((1, F, T), lambda b, t: (b, 0, t)),
        ),
        input_output_aliases={0: 0},
        compiler_params=pltpu.CompilerParams(
            dimension_semantics=("parallel", "parallel")),
    )(x_flat, phi_flat, dy_flat, inv_flat)

    if hw_pad != HW:
        out = out[:, :, :HW]
    return out.reshape(B, F, H, W)


def _identity_denoiser(x):
    # TODO(synk): stand-in for the external denoiser module.
    return x, jnp.zeros((), dtype=x.dtype)


def gap_forward(x, y, phi, _unused, delta_y, step_size=STEP_SIZE):
    """Mirrors Gap.forward(*params) -> (x, y, phi, symmetric)."""
    # NOTE: like the PyTorch forward, the updated delta_y is local state and is
    # not returned by forward.
    x_new = gap_update(x, phi, delta_y, step_size)
    x_den, symmetric = _identity_denoiser(x_new)
    return x_den, y, phi, symmetric


def _reference(x, y, phi, delta_y, step_size=STEP_SIZE):
    # Pure-JAX reference of the PyTorch math (pre-denoiser).
    y_t = (x * phi[None]).sum(axis=1)                       # (B, H, W)
    phi_sum = phi.sum(axis=0)                               # (H, W)
    dy = delta_y[None] + (delta_y[None] - y_t)              # (B, H, W)
    residual = (dy - y_t)[:, None]                          # (B, 1, H, W)
    delta_x = step_size * residual * phi[None] / (phi_sum + 0.0001)
    return x + delta_x


if __name__ == "__main__":
    key = jax.random.PRNGKey(0)
    B, F, H, W = 2, 4, 16, 16
    k1, k2, k3, k4 = jax.random.split(key, 4)

    x = jax.random.normal(k1, (B, F, H, W), dtype=jnp.float32)
    phi = (jax.random.uniform(k2, (F, H, W), dtype=jnp.float32) > 0.5).astype(jnp.float32)
    y = jax.random.normal(k3, (B, H, W), dtype=jnp.float32)       # passthrough measurement
    delta_y = jax.random.normal(k4, (H, W), dtype=jnp.float32)    # Gap.initialize gives zeros; random = stronger test

    x_out, y_out, phi_out, symmetric = gap_forward(x, y, phi, None, delta_y)
    jax.block_until_ready(x_out)

    ref = _reference(x, y, phi, delta_y)
    assert x_out.shape == (B, F, H, W)
    assert jnp.allclose(x_out, ref, atol=1e-5, rtol=1e-5), "mismatch vs reference"

    print("KERNEL_OK")
</pallas_src>

<mosaic_0001>
module attributes {stable_mosaic.version = 11 : i64} {
  func.func @_gap_kernel(%arg0: i32, %arg1: i32, %arg2: memref<1x4x256xf32, #tpu.memory_space<vmem>>, %arg3: memref<4x256xf32, #tpu.memory_space<vmem>>, %arg4: memref<1x256xf32, #tpu.memory_space<vmem>>, %arg5: memref<1x256xf32, #tpu.memory_space<vmem>>, %arg6: memref<1x4x256xf32, #tpu.memory_space<vmem>>) attributes {dimension_semantics = [#tpu.dimension_semantics<parallel>, #tpu.dimension_semantics<parallel>], iteration_bounds = array<i64: 2, 1>, scalar_prefetch = 0 : i64, scratch_operands = 0 : i64, tpu.core_type = #tpu.core_type<tc>, window_params = [{transform_indices = @transform_0, window_bounds = array<i64: 1, 4, 256>}, {transform_indices = @transform_1, window_bounds = array<i64: 4, 256>}, {transform_indices = @transform_2, window_bounds = array<i64: 1, 256>}, {transform_indices = @transform_3, window_bounds = array<i64: 1, 256>}, {transform_indices = @transform_4, window_bounds = array<i64: 1, 4, 256>}]} {
    %c0 = arith.constant 0 : index
    %c0_0 = arith.constant 0 : index
    %c0_1 = arith.constant 0 : index
    %0 = vector.load %arg2[%c0, %c0_0, %c0_1] : memref<1x4x256xf32, #tpu.memory_space<vmem>>, vector<1x4x256xf32>
    %1 = vector.shape_cast %0 : vector<1x4x256xf32> to vector<4x256xf32>
    %c0_2 = arith.constant 0 : index
    %c0_3 = arith.constant 0 : index
    %2 = vector.load %arg3[%c0_2, %c0_3] : memref<4x256xf32, #tpu.memory_space<vmem>>, vector<4x256xf32>
    %3 = arith.mulf %1, %2 : vector<4x256xf32>
    %cst = arith.constant dense<0.000000e+00> : vector<256xf32>
    %4 = vector.multi_reduction <add>, %3, %cst [0] : vector<4x256xf32> to vector<256xf32>
    %5 = vector.shape_cast %4 : vector<256xf32> to vector<1x256xf32>
    %c0_4 = arith.constant 0 : index
    %c0_5 = arith.constant 0 : index
    %6 = vector.load %arg4[%c0_4, %c0_5] : memref<1x256xf32, #tpu.memory_space<vmem>>, vector<1x256xf32>
    %7 = arith.subf %6, %5 : vector<1x256xf32>
    %cst_6 = arith.constant 1.800000e+00 : f32
    %8 = vector.broadcast %cst_6 : f32 to vector<1x256xf32>
    %9 = arith.mulf %8, %7 : vector<1x256xf32>
    %c0_7 = arith.constant 0 : index
    %c0_8 = arith.constant 0 : index
    %10 = vector.load %arg5[%c0_7, %c0_8] : memref<1x256xf32, #tpu.memory_space<vmem>>, vector<1x256xf32>
    %11 = arith.mulf %9, %10 : vector<1x256xf32>
    %12 = vector.broadcast %11 : vector<1x256xf32> to vector<4x256xf32>
    %13 = arith.mulf %12, %2 : vector<4x256xf32>
    %14 = arith.addf %1, %13 : vector<4x256xf32>
    %c0_9 = arith.constant 0 : index
    %c0_10 = arith.constant 0 : index
    %c0_11 = arith.constant 0 : index
    %15 = vector.load %arg6[%c0_9, %c0_10, %c0_11] : memref<1x4x256xf32, #tpu.memory_space<vmem>>, vector<1x4x256xf32>
    %16 = vector.shape_cast %15 : vector<1x4x256xf32> to vector<4x256xf32>
    %17 = vector.shape_cast %14 : vector<4x256xf32> to vector<1x4x256xf32>
    tpu.vector_store %arg6[%c0_9, %c0_10, %c0_11], %17 {strides = array<i32>} : memref<1x4x256xf32, #tpu.memory_space<vmem>>, vector<1x4x256xf32>,
    return
  }
  func.func @transform_0(%arg0: i32, %arg1: i32) -> (i32, i32, i32) {
    %c0_i32 = arith.constant 0 : i32
    %c0_i32_0 = arith.constant 0 : i32
    return %arg0, %c0_i32, %arg1 : i32, i32, i32
  }
  func.func @transform_1(%arg0: i32, %arg1: i32) -> (i32, i32) {
    %c0_i32 = arith.constant 0 : i32
    %c0_i32_0 = arith.constant 0 : i32
    return %c0_i32, %arg1 : i32, i32
  }
  func.func @transform_2(%arg0: i32, %arg1: i32) -> (i32, i32) {
    %c0_i32 = arith.constant 0 : i32
    %c0_i32_0 = arith.constant 0 : i32
    return %c0_i32, %arg1 : i32, i32
  }
  func.func @transform_3(%arg0: i32, %arg1: i32) -> (i32, i32) {
    %c0_i32 = arith.constant 0 : i32
    %c0_i32_0 = arith.constant 0 : i32
    return %c0_i32, %arg1 : i32, i32
  }
  func.func @transform_4(%arg0: i32, %arg1: i32) -> (i32, i32, i32) {
    %c0_i32 = arith.constant 0 : i32
    %c0_i32_0 = arith.constant 0 : i32
    return %arg0, %c0_i32, %arg1 : i32, i32, i32
  }
}

</mosaic_0001>

<bundles_post_ra>
// kernel: tpu_custom_call.1
= control target key start
LH: loop header
LB: loop body
LE: loop exit
PB: predicated region body
PF: predicated region fallthrough
CT: control target
= control target key end

     0   :  { %9 = vsyncpa [#allocation3], 0  ;;  %s911_s0 = inlined_call_operand.hbm [shape: f32[2,4,256], index: 0, kind: input, shape index: {}, may-alias: {0,4}]   ;;  %s912_s1 = inlined_call_operand.vmem [shape: f32[4,256], index: 1, kind: input, shape index: {}]   ;;  %s913_s2 = inlined_call_operand.vmem [shape: f32[1,256], index: 2, kind: input, shape index: {}]   ;;  %s914_s3 = inlined_call_operand.vmem [shape: f32[1,256], index: 3, kind: input, shape index: {}]   ;;  %s915_s4 = inlined_call_operand.hbm [shape: f32[2,4,256], index: 4, kind: output, shape index: {}, may-alias: {0,4}]  }
   0x1   :  { %11 = vsyncpa [#allocation3 + $0x1], 0 }
   0x2   :  { %12 = vsyncpa [#allocation4], 0 }
   0x3   :  { %14 = vsyncpa [#allocation4 + $0x1], 0  ;;  %s726_s15 = smov 0   ;;  %s728_s16 = smov 0  }
   0x4   :  { %s730_s17 = smov 0   ;;  %s732_s18 = smov 0  }
   0x5   :  { %s734_s19 = smov 0   ;;  %s736_s20 = smov 0  }
   0x6 LB: > { %s500_s21 = sadd.s32 4294967295, %s696_s20   ;;  %s501_s22 = sadd.s32 4294967294, %s696_s20   ;;  %s696_s20 = sphi %s736_s20, %s20_s20   ;;  %s692_s19 = sphi %s734_s19, %s931_s19   ;;  %s688_s18 = sphi %s732_s18, %s930_s18   ;;  %s684_s17 = sphi %s730_s17, %s929_s17   ;;  %s680_s16 = sphi %s728_s16, %s928_s16   ;;  %s676_s15 = sphi %s726_s15, %s927_s15  }
   0x7   : > { %s32_s23 = sadd.s32 1, %s692_s19  ;;  %s41_s24 = sadd.s32 1, %s684_s17 }
   0x8   : > { %p34_p0 = scmp.ge.s32.totalorder %s32_s23, 2  ;;  %p48_p1 = scmp.ne.s32.totalorder %s684_s17, %s680_s16 }
   0x9   : > { %p49_p2 = scmp.eq.s32.totalorder %s696_s20, 0  ;;  %p54_p3 = scmp.ne.s32.totalorder %s680_s16, %s676_s15 }
   0xa   : > { %s933_s23 = smov (%p34_p0, %s32_s23), 0  ;;  %p55_p5 = scmp.eq.s32.totalorder %s500_s21, 0 }
   0xb   : > { %p767_p4 = por %p49_p2, %p48_p1  ;;  %s36_s26 = ssub.s32 %s692_s19, %s933_s23 }
   0xc   : > { %p158_p6 = scmp.eq.s32.totalorder %s500_s21, 1  ;;  %p39_p7 = scmp.eq.s32.totalorder %s36_s26, 0 }
   0xd   : > { %p773_p8 = por %p55_p5, %p54_p3  ;;  %p164_p10 = scmp.eq.s32.totalorder %s501_s22, 1 }
   0xe   : > { %p777_p9 = por %p158_p6, %p48_p1  ;;  %p532_p13 = scmp.lt.s32.totalorder %s696_s20, 2 }
   0xf   : > { %s782_s29 = scalar_select %p39_p7, %s684_s17, %s41_s24  }
  0x10   : > { %s919_s28 = scalar_select %p777_p9, 1, 0 }
  0x11   : > { %p784_p11 = por %p164_p10, %p54_p3  ;;  %s209_s5 = sand.u32 1, %s684_s17  }
  0x12   : > { %s507_s6 = sshll.u32 %s209_s5, 3  ;;  %s518_s7 = sshll.u32 %s692_s19, 7 }
  0x13   : > { %s920_s30 = scalar_select %p784_p11, 1, 0 }
  0x14   : > { %s795_s10 = scalar_lea.hbm %s911_s0, %s518_s7  ;;  %s213_s11 = scalar_lea.vmem [#allocation2], %s507_s6 }
  0x15   : > { %s223_s12 = sshll.u32 %s213_s11, 4  ;;  %p801_p0 = pnand %p532_p13, %p767_p4  ;;  %s797_s12 = int_to_ptr.vmem [resolvable:$true] %s223_s12 }
  0x16   : > { %s210_s14 = scalar_lea.sflag [#allocation3], %s209_s5  ;;  %s584_s21 = scalar_lea.hbm %s795_s10, 128 }
  0x17   : > { %p585_p3 = scmp.ne.s32.totalorder %s795_s10, %s584_s21  ;;  %p586_p5 = pneg %p801_p0 }
  0x18   : > { %s589_s25 = scalar_lea.hbm %s911_s0, 256  ;;  %p590_p4 = scmp.lt.u32.totalorder %s795_s10, %s911_s0 }
  0x19   : > { %p587_p6 = pnand %p586_p5, %p585_p3  ;;  %p591_p10 = scmp.lt.u32.totalorder %s589_s25, %s584_s21 }
  0x1a   : > { %p593_p12 = scmp.lt.u32.totalorder %s584_s21, %s795_s10 }
  0x1b   : > { %p588_p7 = pneg %p587_p6  ;;  %p592_p13 = por %p591_p10, %p590_p4 }
  0x1d   : > { %p594_p1 = por %p593_p12, %p592_p13 }
  0x1f   : > { %p595_p2 = pnand %p594_p1, %p588_p7 }
  0x21   : > { %598 = shalt.err (!%p595_p2)
}
  0x22   : > { %s599_s5 = scalar_lea.vmem %s797_s12, 128  ;;  %s698_s7 = smov [#allocation2]  }
  0x23   : > { %p600_p3 = scmp.ne.s32.totalorder %s797_s12, %s599_s5  ;;  %s604_s8 = sshll.u32 %s698_s7, 4  ;;  %s605_s8 = int_to_ptr.vmem [resolvable:$false] %s604_s8 }
  0x24   : > { %s606_s9 = scalar_lea.vmem %s605_s8, 256  ;;  %p607_p9 = scmp.lt.s32.totalorder %s797_s12, %s605_s8 }
  0x25   : > { %p602_p6 = pnand %p600_p3, %p586_p5  ;;  %p608_p4 = scmp.lt.s32.totalorder %s606_s9, %s599_s5 }
  0x27   : > { %p603_p11 = pneg %p602_p6  ;;  %p609_p10 = por %p608_p4, %p607_p9 }
  0x29   : > { %p610_p12 = pnand %p609_p10, %p603_p11 }
  0x2b   : > { %613 = shalt.err (!%p610_p12)
}
  0x2c   : > { %527 = dma.hbm_to_vmem [thread:$0]  (!%p801_p0), %s795_s10, 128, %s797_s12, %s210_s14  }
  0x2d   : > { %p922_p1 = scmp.lt.s32.totalorder %s696_s20, 3  ;;  %p923_p2 = scmp.ge.s32.totalorder %s696_s20, 1 }
  0x2f   : > { %p229_p5 = pnand %p923_p2, %p922_p1 }
  0x30   : > { %s837_s11 = sand.u32 (!%p229_p5), 1, %s680_s16  }
  0x31   : > { %232 = sbr.rel (%p229_p5) target bundleno = 110 (0x6e), region = 36  ;;  %s511_s21 = sshll.u32 (!%p229_p5), %s837_s11, 3 }
  0x32   : > { %s235_s22 = scalar_lea.sflag (!%p229_p5), [#allocation3], %s837_s11  ;;  %s238_s13 = scalar_lea.vmem (!%p229_p5), [#allocation2], %s511_s21 }
  0x38   : > { %667 = dma.done.wait (%p773_p8), %s235_s22, 128  }
  0x39   : > { %669 = vsyncadd (%p773_p8), %s235_s22, 4294967168  ;;  %v294_v0 = vld [vmem:[%s238_s13] sm:$0xff]  ;;  %vm300_vm0 = vcmask 1043456   ;;  %v699_v11 = vmov 1966171168   ;;  %v322_v13 = vlaneseq  ;;  %s275_s26 = scalar_lea.vmem [#allocation5], %s511_s21 }
  0x3a   : > { %v295_v1 = vld [vmem:[%s912_s1] sm:$0xff]  ;;  %v320_v12 = vunpack.c.l.s4 %v699_v11  ;;  %s377_s6 = sshll.u32 %s275_s26, 4  ;;  %s519_s5 = sshll.u32 %s688_s18, 7  ;;  %s859_s6 = int_to_ptr.vmem [resolvable:$true] %s377_s6 }
  0x3b   : > { %v296_v2 = vmul.f32 %v295_v1, %v294_v0  ;;  %v323_v19 = vshrl.u32 %v322_v13, 7  ;;  %v315_v26 = vld [vmem:[%s913_s2] sm:$0x3]  ;;  %v350_v34 = vcombine.high %v295_v1, %v295_v1  ;;  %s864_s9 = scalar_lea.hbm %s915_s4, %s519_s5  ;;  %s361_s22 = scalar_lea.sflag [#allocation4], %s837_s11 }
  0x3c   : > { %v321_v18 = vunpack.c.0.s8 %v320_v12  ;;  %v336_v29 = vld [vmem:[%s914_s3] sm:$0x3]  ;;  %s614_s13 = scalar_lea.vmem %s859_s6, 128  ;;  %p924_p9 = scmp.ne.s32.totalorder %s919_s28, 0 }
  0x3d   : > { %v298_v3 = vcombine.high %v296_v2, %v296_v2  ;;  %v301_v4 = vsel %vm300_vm0, %v296_v2, 0.0  ;;  %v341_v31 = vsub.s32 0, %v323_v19  ;;  %v345_v32 = vsub.s32 1, %v323_v19  ;;  %p615_p8 = scmp.ne.s32.totalorder %s859_s6, %s614_s13  ;;  %s700_s18 = smov [#allocation5]  }
  0x3e   : > { %v302_v5 = vrot.slane %v301_v4, 4  ;;  %v324_v23 = vsub.s32 %v321_v18, %v323_v19  ;;  %s618_s21 = sshll.u32 %s700_s18, 4  ;;  %s619_s21 = int_to_ptr.vmem [resolvable:$false] %s618_s21 }
  0x3f   : > { %v308_v6 = vsel %vm300_vm0, %v298_v3, 0.0  ;;  %p616_p11 = pnand %p615_p8, %p924_p9  ;;  %s620_s10 = scalar_lea.vmem %s619_s21, 256 }
  0x40   : > { %v303_v7 = vadd.f32 %v302_v5, %v301_v4  ;;  %v309_v8 = vrot.slane %v308_v6, 4  ;;  %p621_p7 = scmp.lt.s32.totalorder %s859_s6, %s619_s21  ;;  %p622_p13 = scmp.lt.s32.totalorder %s620_s10, %s614_s13 }
  0x41   : > { %p617_p0 = pneg %p616_p11 }
  0x42   : > { %v304_v9 = vrot.slane %v303_v7, 2  ;;  %v310_v10 = vadd.f32 %v309_v8, %v308_v6  ;;  %p623_p3 = por %p622_p13, %p621_p7 }
  0x44   : > { %v305_v14 = vadd.f32 %v304_v9, %v303_v7  ;;  %v311_v15 = vrot.slane %v310_v10, 2  ;;  %p624_p6 = pnand %p623_p3, %p617_p0 }
  0x46   : > { %v306_v16 = vrot.slane %v305_v14, 1  ;;  %v312_v17 = vadd.f32 %v311_v15, %v310_v10 }
  0x48   : > { %v307_v20 = vadd.f32 %v306_v16, %v305_v14  ;;  %v313_v21 = vrot.slane %v312_v17, 1 }
  0x4a   : > { %v314_v22 = vadd.f32 %v313_v21, %v312_v17 }
  0x4c   : > { %v318_v24 = vcombine.low %v307_v20, %v314_v22 }
  0x4e   : > { %v325_v25 = vrot.slane %v318_v24, %v324_v23 }
  0x50   : > { %v332_v27 = vrot.slane %v325_v25, %v324_v23 }
  0x52   : > { %v334_v28 = vsub.f32 %v315_v26, %v332_v27 }
  0x54   : > { %v335_v30 = vmul.f32 1.8, %v334_v28 }
  0x56   : > { %v337_v33 = vmul.f32 %v336_v29, %v335_v30 }
  0x58   : > { %v342_v35 = vrot.slane %v337_v33, %v341_v31  ;;  %v346_v36 = vrot.slane %v337_v33, %v345_v32 }
  0x5a   : > { %v352_v37 = vmul.f32 %v342_v35, %v295_v1  ;;  %v353_v38 = vmul.f32 %v350_v34, %v346_v36 }
  0x5c   : > { %v356_v39 = vcombine.low %v352_v37, %v353_v38 }
  0x5e   : > { %v358_v40 = vadd.f32 %v356_v39, %v294_v0 }
  0x60   : > { %359 = vst [vmem:[%s275_s26] sm:$0xff] %v358_v40 }
  0x61   : > { %627 = shalt.err (!%p624_p6)
}
  0x62   : > { %s628_s11 = scalar_lea.hbm %s864_s9, 128  ;;  %s632_s14 = scalar_lea.hbm %s915_s4, 256 }
  0x63   : > { %p629_p4 = scmp.ne.s32.totalorder %s864_s9, %s628_s11  ;;  %p633_p1 = scmp.lt.u32.totalorder %s864_s9, %s915_s4 }
  0x64   : > { %p634_p2 = scmp.lt.u32.totalorder %s632_s14, %s628_s11  ;;  %p636_p8 = scmp.lt.u32.totalorder %s628_s11, %s864_s9 }
  0x65   : > { %p630_p10 = pnand %p629_p4, %p924_p9 }
  0x66   : > { %p635_p5 = por %p634_p2, %p633_p1 }
  0x67   : > { %p631_p12 = pneg %p630_p10 }
  0x68   : > { %p637_p11 = por %p636_p8, %p635_p5 }
  0x6a   : > { %p638_p0 = pnand %p637_p11, %p631_p12 }
  0x6c   : > { %641 = shalt.err (!%p638_p0)
}
  0x6d   : > { %522 = dma.vmem_to_hbm [thread:$0]  (%p924_p9), %s859_s6, 128, %s864_s9, %s361_s22  }
  0x6e PF: > { %s389_s26 = sand.u32 1, %s676_s15   ;;  %p925_p7 = scmp.ne.s32.totalorder %s920_s30, 0 }
  0x6f   : > { %p926_p13 = scmp.ge.s32.totalorder %s696_s20, 2  ;;  %s390_s5 = scalar_lea.sflag [#allocation4], %s389_s26 }
  0x71   : > { %p529_p3 = pnand %p926_p13, %p925_p7 }
  0x73   : > { %671 = dma.done.wait (!%p529_p3), %s390_s5, 128  }
  0x74   : > { %673 = vsyncadd (!%p529_p3), %s390_s5, 4294967168  ;;  %s20_s20 = sadd.s32 1, %s696_s20   ;;  %s927_s15 = smov %s680_s16 }
  0x75   : > { %p17_p6 = scmp.ge.s32.totalorder %s20_s20, 4   ;;  %s928_s16 = smov %s684_s17 }
  0x76   : > { %s929_s17 = smov %s782_s29  ;;  %s930_s18 = smov %s692_s19 }
  0x77   : > { %s931_s19 = smov %s933_s23  ;;  %19 = sbr.rel (!%p17_p6) target bundleno = 6 (0x6), region = 90 }
  0x7e   :  { %395 = vsyncpa [#allocation3], 1 }
  0x7f   :  { %397 = vsyncpa [#allocation3 + $0x1], 1 }
  0x80   :  { %398 = vsyncpa [#allocation4], 1 }
  0x81   :  { %400 = vsyncpa [#allocation4 + $0x1], 1 }

</bundles_post_ra>
